<compile_context>
chip_gen: v7x
topology: tpu7x:2x2x1
jax: 0.10.0
libtpu: 0.0.40
codegen_flags: <defaults>
</compile_context>

<pallas_src>
import functools

import jax
import jax.numpy as jnp
from jax.experimental import pallas as pl
from jax.experimental.pallas import tpu as pltpu

INPUT_DIM = 55
H1, H2, OUT = 128, 64, 32
NEG_SLOPE = 0.01          # nn.LeakyReLU default negative_slope
BATCH_BUCKET = 256        # pad batch to a multiple of this (bounds pad waste & recompiles)
DEFAULT_TILE_B = 2048     # review-recommended default; multiple of 256, VMEM-safe on v5e


def _leaky_relu(x):
    # Equivalent to where(x > 0, x, slope*x) for 0 < slope < 1; 2 VPU ops.
    return jnp.maximum(x, NEG_SLOPE * x)


def feature_extractor_kernel(x_ref, w1_ref, b1_ref, w2_ref, b2_ref,
                             w3_ref, b3_ref, o_ref):
    x = x_ref[...]                                                    # (TB, 55)

    h = jnp.dot(x, w1_ref[...], preferred_element_type=jnp.float32)  # (TB, 128)
    h = _leaky_relu(h + b1_ref[...])

    h = jnp.dot(h, w2_ref[...], preferred_element_type=jnp.float32)  # (TB, 64)
    h = _leaky_relu(h + b2_ref[...])

    h = jnp.dot(h, w3_ref[...], preferred_element_type=jnp.float32)  # (TB, 32)
    o_ref[...] = (h + b3_ref[...]).astype(o_ref.dtype)


def _round_up(x, m):
    return (x + m - 1) // m * m


def _pick_tile(b_pad, tile_b):
    """Largest multiple of BATCH_BUCKET that divides b_pad and is <= tile_b."""
    d = min(tile_b, b_pad)
    d -= d % BATCH_BUCKET
    while d > BATCH_BUCKET:
        if b_pad % d == 0:
            return d
        d -= BATCH_BUCKET
    return BATCH_BUCKET   # always divides b_pad (b_pad is a multiple of it)


@functools.partial(jax.jit, static_argnames=("tile_b",))
def _feature_extractor_padded(x_pad, w1, b1, w2, b2, w3, b3, *, tile_b):
    b_pad = x_pad.shape[0]
    grid = (b_pad // tile_b,)

    def resident(shape):
        # Full-array block, constant index -> DMA'd once, stays in VMEM.
        return pl.BlockSpec(shape, lambda i: (0, 0))

    flops = 2 * b_pad * (INPUT_DIM * H1 + H1 * H2 + H2 * OUT)
    w_bytes = 4 * (INPUT_DIM * H1 + H1 + H1 * H2 + H2 + H2 * OUT + OUT)
    bytes_accessed = 4 * b_pad * (INPUT_DIM + OUT) + w_bytes

    return pl.pallas_call(
        feature_extractor_kernel,
        out_shape=jax.ShapeDtypeStruct((b_pad, OUT), jnp.float32),
        grid=grid,
        in_specs=[
            pl.BlockSpec((tile_b, INPUT_DIM), lambda i: (i, 0)),  # x: batch-tiled
            resident(w1.shape), resident(b1.shape),
            resident(w2.shape), resident(b2.shape),
            resident(w3.shape), resident(b3.shape),
        ],
        out_specs=pl.BlockSpec((tile_b, OUT), lambda i: (i, 0)),
        compiler_params=pltpu.CompilerParams(
            dimension_semantics=("parallel",)),  # megacore sharding on v7x
        cost_estimate=pl.CostEstimate(
            flops=flops, transcendentals=0, bytes_accessed=bytes_accessed),
    )(x_pad, w1, b1, w2, b2, w3, b3)


def feature_extractor(x, params, *, tile_b=DEFAULT_TILE_B):
    """x: (B, INPUT_DIM) float32. params: dict of w1,b1,w2,b2,w3,b3.

    Weights are (in_features, out_features) (transpose of nn.Linear.weight),
    biases are (1, out_features).
    """
    assert tile_b % BATCH_BUCKET == 0, "tile_b must be a multiple of 256"
    B = x.shape[0]
    b_pad = _round_up(max(B, 1), BATCH_BUCKET)
    eff_tile = _pick_tile(b_pad, tile_b)
    if b_pad != B:
        x = jnp.pad(x, ((0, b_pad - B), (0, 0)))
    out = _feature_extractor_padded(
        x,
        params["w1"], params["b1"],
        params["w2"], params["b2"],
        params["w3"], params["b3"],
        tile_b=eff_tile,
    )
    return out[:B]


def init_params(key):
    """Deterministic init mimicking nn.Linear's uniform(-1/sqrt(fan_in), +)."""
    ks = jax.random.split(key, 6)

    def linear(kw, kb, fan_in, fan_out):
        bound = 1.0 / jnp.sqrt(float(fan_in))
        w = jax.random.uniform(kw, (fan_in, fan_out), jnp.float32, -bound, bound)
        b = jax.random.uniform(kb, (1, fan_out), jnp.float32, -bound, bound)
        return w, b

    w1, b1 = linear(ks[0], ks[1], INPUT_DIM, H1)
    w2, b2 = linear(ks[2], ks[3], H1, H2)
    w3, b3 = linear(ks[4], ks[5], H2, OUT)
    return dict(w1=w1, b1=b1, w2=w2, b2=b2, w3=w3, b3=b3)


def reference(x, p):
    h = x @ p["w1"] + p["b1"]
    h = jnp.where(h > 0, h, NEG_SLOPE * h)
    h = h @ p["w2"] + p["b2"]
    h = jnp.where(h > 0, h, NEG_SLOPE * h)
    return h @ p["w3"] + p["b3"]


if __name__ == "__main__":
    key = jax.random.PRNGKey(0)
    k_x, k_x2, k_x3, k_p = jax.random.split(key, 4)
    params = init_params(k_p)

    # Small batch (single-tile path, padded to one 256-row bucket).
    B = 8
    x = jax.random.normal(k_x, (B, INPUT_DIM), jnp.float32)
    out = jax.block_until_ready(feature_extractor(x, params))
    ref = reference(x, params)
    assert out.shape == (B, OUT), out.shape
    assert jnp.allclose(out, ref, atol=2e-5, rtol=2e-5), \
        float(jnp.max(jnp.abs(out - ref)))

    # Non-multiple batch with the default (large) tile: pads to 512, grid=1.
    B2 = 300
    x2 = jax.random.normal(k_x2, (B2, INPUT_DIM), jnp.float32)
    out2 = jax.block_until_ready(feature_extractor(x2, params))
    ref2 = reference(x2, params)
    assert out2.shape == (B2, OUT), out2.shape
    assert jnp.allclose(out2, ref2, atol=2e-5, rtol=2e-5), \
        float(jnp.max(jnp.abs(out2 - ref2)))

    # Multi-tile grid path (tile_b override keeps shapes small): pads to 768,
    # tile 256, grid of 3 steps -> exercises double-buffering + parallel axis.
    B3 = 600
    x3 = jax.random.normal(k_x3, (B3, INPUT_DIM), jnp.float32)
    out3 = jax.block_until_ready(feature_extractor(x3, params, tile_b=256))
    ref3 = reference(x3, params)
    assert out3.shape == (B3, OUT), out3.shape
    assert jnp.allclose(out3, ref3, atol=2e-5, rtol=2e-5), \
        float(jnp.max(jnp.abs(out3 - ref3)))

    print("KERNEL_OK")
</pallas_src>

<mosaic_0001>
module attributes {stable_mosaic.version = 11 : i64} {
  func.func @feature_extractor_kernel(%arg0: i32, %arg1: memref<256x55xf32, #tpu.memory_space<vmem>>, %arg2: memref<55x128xf32, #tpu.memory_space<vmem>>, %arg3: memref<1x128xf32, #tpu.memory_space<vmem>>, %arg4: memref<128x64xf32, #tpu.memory_space<vmem>>, %arg5: memref<1x64xf32, #tpu.memory_space<vmem>>, %arg6: memref<64x32xf32, #tpu.memory_space<vmem>>, %arg7: memref<1x32xf32, #tpu.memory_space<vmem>>, %arg8: memref<256x32xf32, #tpu.memory_space<vmem>>) attributes {dimension_semantics = [#tpu.dimension_semantics<parallel>], iteration_bounds = array<i64: 1>, scalar_prefetch = 0 : i64, scratch_operands = 0 : i64, tpu.core_type = #tpu.core_type<tc>, window_params = [{transform_indices = @transform_0, window_bounds = array<i64: 256, 55>}, {pipeline_mode = #tpu.pipeline_mode<synchronous>, transform_indices = @transform_1, window_bounds = array<i64: 55, 128>}, {pipeline_mode = #tpu.pipeline_mode<synchronous>, transform_indices = @transform_2, window_bounds = array<i64: 1, 128>}, {pipeline_mode = #tpu.pipeline_mode<synchronous>, transform_indices = @transform_3, window_bounds = array<i64: 128, 64>}, {pipeline_mode = #tpu.pipeline_mode<synchronous>, transform_indices = @transform_4, window_bounds = array<i64: 1, 64>}, {pipeline_mode = #tpu.pipeline_mode<synchronous>, transform_indices = @transform_5, window_bounds = array<i64: 64, 32>}, {pipeline_mode = #tpu.pipeline_mode<synchronous>, transform_indices = @transform_6, window_bounds = array<i64: 1, 32>}, {transform_indices = @transform_7, window_bounds = array<i64: 256, 32>}]} {
    %c0 = arith.constant 0 : index
    %c0_0 = arith.constant 0 : index
    %0 = vector.load %arg1[%c0, %c0_0] : memref<256x55xf32, #tpu.memory_space<vmem>>, vector<256x55xf32>
    %c0_1 = arith.constant 0 : index
    %c0_2 = arith.constant 0 : index
    %1 = vector.load %arg2[%c0_1, %c0_2] : memref<55x128xf32, #tpu.memory_space<vmem>>, vector<55x128xf32>
    %cst = arith.constant dense<0.000000e+00> : vector<256x128xf32>
    %2 = tpu.matmul %0, %1, %cst {dimension_numbers = #tpu.dot_dimension_numbers<[1], [0], [0], [1], [0, 0, 1, 1], [], []>} : vector<256x55xf32>, vector<55x128xf32>, vector<256x128xf32> -> vector<256x128xf32>
    %c0_3 = arith.constant 0 : index
    %c0_4 = arith.constant 0 : index
    %3 = vector.load %arg3[%c0_3, %c0_4] : memref<1x128xf32, #tpu.memory_space<vmem>>, vector<1x128xf32>
    %4 = vector.broadcast %3 : vector<1x128xf32> to vector<256x128xf32>
    %5 = arith.addf %2, %4 : vector<256x128xf32>
    %cst_5 = arith.constant 0.00999999977 : f32
    %6 = vector.broadcast %cst_5 : f32 to vector<256x128xf32>
    %7 = arith.mulf %6, %5 : vector<256x128xf32>
    %8 = arith.maximumf %5, %7 : vector<256x128xf32>
    %c0_6 = arith.constant 0 : index
    %c0_7 = arith.constant 0 : index
    %9 = vector.load %arg4[%c0_6, %c0_7] : memref<128x64xf32, #tpu.memory_space<vmem>>, vector<128x64xf32>
    %cst_8 = arith.constant dense<0.000000e+00> : vector<256x64xf32>
    %10 = tpu.matmul %8, %9, %cst_8 {dimension_numbers = #tpu.dot_dimension_numbers<[1], [0], [0], [1], [0, 0, 1, 1], [], []>} : vector<256x128xf32>, vector<128x64xf32>, vector<256x64xf32> -> vector<256x64xf32>
    %c0_9 = arith.constant 0 : index
    %c0_10 = arith.constant 0 : index
    %11 = vector.load %arg5[%c0_9, %c0_10] : memref<1x64xf32, #tpu.memory_space<vmem>>, vector<1x64xf32>
    %12 = vector.broadcast %11 : vector<1x64xf32> to vector<256x64xf32>
    %13 = arith.addf %10, %12 : vector<256x64xf32>
    %cst_11 = arith.constant 0.00999999977 : f32
    %14 = vector.broadcast %cst_11 : f32 to vector<256x64xf32>
    %15 = arith.mulf %14, %13 : vector<256x64xf32>
    %16 = arith.maximumf %13, %15 : vector<256x64xf32>
    %c0_12 = arith.constant 0 : index
    %c0_13 = arith.constant 0 : index
    %17 = vector.load %arg6[%c0_12, %c0_13] : memref<64x32xf32, #tpu.memory_space<vmem>>, vector<64x32xf32>
    %cst_14 = arith.constant dense<0.000000e+00> : vector<256x32xf32>
    %18 = tpu.matmul %16, %17, %cst_14 {dimension_numbers = #tpu.dot_dimension_numbers<[1], [0], [0], [1], [0, 0, 1, 1], [], []>} : vector<256x64xf32>, vector<64x32xf32>, vector<256x32xf32> -> vector<256x32xf32>
    %c0_15 = arith.constant 0 : index
    %c0_16 = arith.constant 0 : index
    %19 = vector.load %arg7[%c0_15, %c0_16] : memref<1x32xf32, #tpu.memory_space<vmem>>, vector<1x32xf32>
    %20 = vector.broadcast %19 : vector<1x32xf32> to vector<256x32xf32>
    %21 = arith.addf %18, %20 : vector<256x32xf32>
    %c0_17 = arith.constant 0 : index
    %c0_18 = arith.constant 0 : index
    %22 = vector.load %arg8[%c0_17, %c0_18] : memref<256x32xf32, #tpu.memory_space<vmem>>, vector<256x32xf32>
    tpu.vector_store %arg8[%c0_17, %c0_18], %21 {strides = array<i32>} : memref<256x32xf32, #tpu.memory_space<vmem>>, vector<256x32xf32>,
    return
  }
  func.func @transform_0(%arg0: i32) -> (i32, i32) {
    %c0_i32 = arith.constant 0 : i32
    %c0_i32_0 = arith.constant 0 : i32
    return %arg0, %c0_i32 : i32, i32
  }
  func.func @transform_1(%arg0: i32) -> (i32, i32) {
    %c0_i32 = arith.constant 0 : i32
    %c0_i32_0 = arith.constant 0 : i32
    %c0_i32_1 = arith.constant 0 : i32
    return %c0_i32, %c0_i32_0 : i32, i32
  }
  func.func @transform_2(%arg0: i32) -> (i32, i32) {
    %c0_i32 = arith.constant 0 : i32
    %c0_i32_0 = arith.constant 0 : i32
    %c0_i32_1 = arith.constant 0 : i32
    return %c0_i32, %c0_i32_0 : i32, i32
  }
  func.func @transform_3(%arg0: i32) -> (i32, i32) {
    %c0_i32 = arith.constant 0 : i32
    %c0_i32_0 = arith.constant 0 : i32
    %c0_i32_1 = arith.constant 0 : i32
    return %c0_i32, %c0_i32_0 : i32, i32
  }
  func.func @transform_4(%arg0: i32) -> (i32, i32) {
    %c0_i32 = arith.constant 0 : i32
    %c0_i32_0 = arith.constant 0 : i32
    %c0_i32_1 = arith.constant 0 : i32
    return %c0_i32, %c0_i32_0 : i32, i32
  }
  func.func @transform_5(%arg0: i32) -> (i32, i32) {
    %c0_i32 = arith.constant 0 : i32
    %c0_i32_0 = arith.constant 0 : i32
    %c0_i32_1 = arith.constant 0 : i32
    return %c0_i32, %c0_i32_0 : i32, i32
  }
  func.func @transform_6(%arg0: i32) -> (i32, i32) {
    %c0_i32 = arith.constant 0 : i32
    %c0_i32_0 = arith.constant 0 : i32
    %c0_i32_1 = arith.constant 0 : i32
    return %c0_i32, %c0_i32_0 : i32, i32
  }
  func.func @transform_7(%arg0: i32) -> (i32, i32) {
    %c0_i32 = arith.constant 0 : i32
    %c0_i32_0 = arith.constant 0 : i32
    return %arg0, %c0_i32 : i32, i32
  }
}

</mosaic_0001>

<bundles_post_ra>
// kernel: _feature_extractor_padded.1
= control target key start
LH: loop header
LB: loop body
LE: loop exit
PB: predicated region body
PF: predicated region fallthrough
CT: control target
= control target key end

     0   :  { %vm72_vm0 = vcmask 449536   ;;  %vm169_vm1 = vcmask 1046528   ;;  %vm789_vm2 = vcmask 523264   ;;  %vm1111_vm3 = vcmask 261120   ;;  %s2192_s1 = inlined_call_operand.vmem [shape: f32[55,128], index: 1, kind: input, shape index: {}]   ;;  %s2193_s0 = inlined_call_operand.vmem [shape: f32[256,55], index: 0, kind: input, shape index: {}]   ;;  %s2194_s3 = inlined_call_operand.vmem [shape: f32[128,64], index: 3, kind: input, shape index: {}]   ;;  %s2195_s5 = inlined_call_operand.vmem [shape: f32[64,32], index: 5, kind: input, shape index: {}]   ;;  %s2196_s2 = inlined_call_operand.vmem [shape: f32[1,128], index: 2, kind: input, shape index: {}]   ;;  %s2197_s4 = inlined_call_operand.vmem [shape: f32[1,64], index: 4, kind: input, shape index: {}]   ;;  %s2198_s6 = inlined_call_operand.vmem [shape: f32[1,32], index: 6, kind: input, shape index: {}]   ;;  %s2199_s7 = inlined_call_operand.vmem [shape: f32[256,32], index: 7, kind: output, shape index: {}]  }
   0x1   :  { %v58_v0 = vld [vmem:[%s2192_s1] sm:$0xff]  ;;  %v59_v1 = vld [vmem:[%s2192_s1 + $0x8] sm:$0xff]  ;;  %v60_v2 = vld [vmem:[%s2192_s1 + $0x10] sm:$0xff] }
   0x2   :  { %v1549_v3 = vpack.c.bf16 %v59_v1, %v58_v0  ;;  %v61_v4 = vld [vmem:[%s2192_s1 + $0x18] sm:$0xff]  ;;  %v62_v6 = vld [vmem:[%s2192_s1 + $0x20] sm:$0xff]  ;;  %v63_v7 = vld [vmem:[%s2192_s1 + $0x28] sm:$0xff] }
   0x3   :  { %v1553_v5 = vpack.c.bf16 %v61_v4, %v60_v2  ;;  %v26_v8 = vld [vmem:[%s2193_s0] sm:$0xff]  ;;  %v1557_v9 = vpack.c.bf16 %v63_v7, %v62_v6  ;;  %v64_v11 = vld [vmem:[%s2192_s1 + $0x30] sm:$0x7f]  ;;  %v463_v13 = vld [vmem:[%s2194_s3 + $0x8] sm:$0xff] }
   0x4   :  { %1550 = vmatprep.subr.bf16.mxu0 %v1549_v3  ;;  %1357 = vmatprep.mubr.msk.f32.mxu0 %vm72_vm0, %v26_v8  ;;  %v42_v10 = vld [vmem:[%s2193_s0 + $0x80] sm:$0xff]  ;;  %v27_v14 = vld [vmem:[%s2193_s0 + $0x8] sm:$0xff]  ;;  %v464_v15 = vld [vmem:[%s2194_s3 + $0x10] sm:$0xff] }
   0x5   :  { %1552 = vmatpush3.bf16.msra.mxu0 %v1549_v3  ;;  %1609 = vmatprep.subr.bf16.mxu1 %v1549_v3  ;;  %v462_v12 = vld [vmem:[%s2194_s3] sm:$0xff]  ;;  %v465_v16 = vld [vmem:[%s2194_s3 + $0x18] sm:$0xff]  ;;  %v28_v17 = vld [vmem:[%s2193_s0 + $0x10] sm:$0xff] }
   0x6   :  { %1554 = vmatprep.subr.bf16.mxu0 %v1553_v5  ;;  %1613 = vmatpush3.bf16.msra.mxu1 %v1549_v3  ;;  %v43_v18 = vld [vmem:[%s2193_s0 + $0x88] sm:$0xff]  ;;  %v1561_v19 = vpack.c.bf16 %v463_v13, %v462_v12  ;;  %v44_v20 = vld [vmem:[%s2193_s0 + $0x90] sm:$0xff]  ;;  %v1565_v21 = vpack.c.bf16 %v465_v16, %v464_v15  ;;  %v29_v22 = vld [vmem:[%s2193_s0 + $0x18] sm:$0xff] }
   0x7   :  { %1610 = vmatprep.subr.bf16.mxu1 %v1553_v5  ;;  %1381 = vmatprep.mubr.msk.f32.mxu1 %vm72_vm0, %v42_v10  ;;  %v466_v23 = vld [vmem:[%s2194_s3 + $0x20] sm:$0xff]  ;;  %v467_v24 = vld [vmem:[%s2194_s3 + $0x28] sm:$0xff]  ;;  %v45_v26 = vld [vmem:[%s2193_s0 + $0x98] sm:$0xff] }
   0x8   :  { %v30_v25 = vld [vmem:[%s2193_s0 + $0x20] sm:$0xff]  ;;  %v1569_v28 = vpack.c.bf16 %v467_v24, %v466_v23  ;;  %v31_v29 = vld [vmem:[%s2193_s0 + $0x28] sm:$0xff]  ;;  %v468_v30 = vld [vmem:[%s2194_s3 + $0x30] sm:$0xff] }
   0x9   :  { %1556 = vmatpush3.bf16.msra.mxu0 %v1553_v5  ;;  %v46_v27 = vld [vmem:[%s2193_s0 + $0xa0] sm:$0xff]  ;;  %v469_v31 = vld [vmem:[%s2194_s3 + $0x38] sm:$0xff]  ;;  %v32_v32 = vld [vmem:[%s2193_s0 + $0x30] sm:$0xff] }
   0xa   :  { %1558 = vmatprep.subr.bf16.mxu0 %v1557_v9  ;;  %1614 = vmatpush3.bf16.msra.mxu1 %v1553_v5  ;;  %v47_v33 = vld [vmem:[%s2193_s0 + $0xa8] sm:$0xff]  ;;  %v48_v34 = vld [vmem:[%s2193_s0 + $0xb0] sm:$0xff]  ;;  %v1573_v35 = vpack.c.bf16 %v469_v31, %v468_v30  ;;  %v33_v36 = vld [vmem:[%s2193_s0 + $0x38] sm:$0xff] }
   0xb   :  { %1611 = vmatprep.subr.bf16.mxu1 %v1557_v9  ;;  %v470_v37 = vld [vmem:[%s2194_s3 + $0x40] sm:$0xff]  ;;  %v471_v38 = vld [vmem:[%s2194_s3 + $0x48] sm:$0xff]  ;;  %v49_v40 = vld [vmem:[%s2193_s0 + $0xb8] sm:$0xff] }
   0xc   :  { %v34_v39 = vld [vmem:[%s2193_s0 + $0x40] sm:$0xff]  ;;  %v1577_v42 = vpack.c.bf16 %v471_v38, %v470_v37  ;;  %v35_v43 = vld [vmem:[%s2193_s0 + $0x48] sm:$0xff]  ;;  %v472_v44 = vld [vmem:[%s2194_s3 + $0x50] sm:$0xff] }
   0xd   :  { %1560 = vmatpush3.bf16.msra.mxu0 %v1557_v9  ;;  %v50_v41 = vld [vmem:[%s2193_s0 + $0xc0] sm:$0xff]  ;;  %v473_v45 = vld [vmem:[%s2194_s3 + $0x58] sm:$0xff]  ;;  %v36_v46 = vld [vmem:[%s2193_s0 + $0x50] sm:$0xff] }
   0xe   :  { %1355 = vmatprep.subr.msk.mxu0 %vm169_vm1, %v64_v11  ;;  %1615 = vmatpush3.bf16.msra.mxu1 %v1557_v9  ;;  %v51_v47 = vld [vmem:[%s2193_s0 + $0xc8] sm:$0xff]  ;;  %v52_v48 = vld [vmem:[%s2193_s0 + $0xd0] sm:$0xff]  ;;  %v1581_v49 = vpack.c.bf16 %v473_v45, %v472_v44  ;;  %v37_v50 = vld [vmem:[%s2193_s0 + $0x58] sm:$0xff] }
   0xf   :  { %1612 = vmatprep.subr.msk.mxu1 %vm169_vm1, %v64_v11  ;;  %v38_v51 = vld [vmem:[%s2193_s0 + $0x60] sm:$0xff]  ;;  %v53_v52 = vld [vmem:[%s2193_s0 + $0xd8] sm:$0xff]  ;;  %v39_v54 = vld [vmem:[%s2193_s0 + $0x68] sm:$0xff] }
  0x10   :  { %v54_v53 = vld [vmem:[%s2193_s0 + $0xe0] sm:$0xff]  ;;  %v40_v55 = vld [vmem:[%s2193_s0 + $0x70] sm:$0xff]  ;;  %v55_v56 = vld [vmem:[%s2193_s0 + $0xe8] sm:$0xff] }
  0x11   :  { %1356 = vmatpush3.msk.msra.mxu0 %vm169_vm1, %v64_v11  ;;  %v56_v57 = vld [vmem:[%s2193_s0 + $0xf0] sm:$0xff]  ;;  %v41_v58 = vld [vmem:[%s2193_s0 + $0x78] sm:$0xff]  ;;  %v474_v60 = vld [vmem:[%s2194_s3 + $0x60] sm:$0xff] }
  0x12   :  { %1358 = vmatmul.mubr.msk.f32.vlgmr.msra.gmra.mrb[0].mxu0 %vm72_vm0, %v27_v14  ;;  %1616 = vmatpush3.msk.msra.mxu1 %vm169_vm1, %v64_v11  ;;  %v57_v59 = vld [vmem:[%s2193_s0 + $0xf8] sm:$0xff]  ;;  %v475_v61 = vld [vmem:[%s2194_s3 + $0x68] sm:$0xff]  ;;  %v476_v63 = vld [vmem:[%s2194_s3 + $0x70] sm:$0xff] }
  0x13   :  { %1360 = vmatprep.mubr.msk.f32.mxu0 %vm72_vm0, %v28_v17  ;;  %1382 = vmatmul.mubr.msk.f32.vlgmr.msra.gmra.mrb[0].mxu1 %vm72_vm0, %v43_v18  ;;  %v1585_v62 = vpack.c.bf16 %v475_v61, %v474_v60  ;;  %v477_v0 = vld [vmem:[%s2194_s3 + $0x78] sm:$0xff]  ;;  %v774_v2 = vld [vmem:[%s2195_s5] sm:$0xff]  ;;  %v775_v3 = vld [vmem:[%s2195_s5 + $0x8] sm:$0xff] }
  0x14   :  { %1384 = vmatprep.mubr.msk.f32.mxu1 %vm72_vm0, %v44_v20  ;;  %1562 = vmatprep.subr.bf16.mxu1 %v1561_v19  ;;  %v1589_v1 = vpack.c.bf16 %v477_v0, %v476_v63  ;;  %v776_v4 = vld [vmem:[%s2195_s5 + $0x10] sm:$0xff]  ;;  %v1593_v5 = vpack.c.bf16 %v775_v3, %v774_v2  ;;  %v777_v6 = vld [vmem:[%s2195_s5 + $0x18] sm:$0xff]  ;;  %v778_v8 = vld [vmem:[%s2195_s5 + $0x20] sm:$0xff] }
  0x15   :  { %1564 = vmatpush3.bf16.msra.mxu1 %v1561_v19  ;;  %v1597_v7 = vpack.c.bf16 %v777_v6, %v776_v4  ;;  %v779_v9 = vld [vmem:[%s2195_s5 + $0x28] sm:$0xff]  ;;  %v1879_v11 = vld [vmem:[%s2196_s2] ss:$0 sm:$0xff] }
  0x16   :  { %1361 = vmatmul.mubr.msk.f32.gmra.mrb[2].mxu0 %vm72_vm0, %v29_v22  ;;  %1566 = vmatprep.subr.bf16.mxu1 %v1565_v21  ;;  %v1601_v10 = vpack.c.bf16 %v779_v9, %v778_v8 }
  0x17   :  { %1363 = vmatprep.mubr.msk.f32.mxu0 %vm72_vm0, %v30_v25  ;;  %1385 = vmatmul.mubr.msk.f32.gmra.mrb[2].mxu1 %vm72_vm0, %v45_v26 }
  0x18   :  { %1387 = vmatprep.mubr.msk.f32.mxu1 %vm72_vm0, %v46_v27  ;;  %1594 = vmatprep.subr.bf16.mxu0 %v1593_v5 }
  0x19   :  { %1568 = vmatpush3.bf16.msra.mxu1 %v1565_v21  ;;  %1596 = vmatpush3.bf16.msra.mxu0 %v1593_v5 }
  0x1a   :  { %1364 = vmatmul.mubr.msk.f32.gmra.mrb[4].mxu0 %vm72_vm0, %v31_v29  ;;  %1570 = vmatprep.subr.bf16.mxu1 %v1569_v28 }
  0x1b   :  { %1366 = vmatprep.mubr.msk.f32.mxu0 %vm72_vm0, %v32_v32  ;;  %1388 = vmatmul.mubr.msk.f32.gmra.mrb[4].mxu1 %vm72_vm0, %v47_v33 }
  0x1c   :  { %1390 = vmatprep.mubr.msk.f32.mxu1 %vm72_vm0, %v48_v34  ;;  %1598 = vmatprep.subr.bf16.mxu0 %v1597_v7 }
  0x1d   :  { %1572 = vmatpush3.bf16.msra.mxu1 %v1569_v28  ;;  %1600 = vmatpush3.bf16.msra.mxu0 %v1597_v7 }
  0x1e   :  { %1367 = vmatmul.mubr.msk.f32.gmra.mrb[6].mxu0 %vm72_vm0, %v33_v36  ;;  %1574 = vmatprep.subr.bf16.mxu1 %v1573_v35 }
  0x1f   :  { %1369 = vmatprep.mubr.msk.f32.mxu0 %vm72_vm0, %v34_v39  ;;  %1391 = vmatmul.mubr.msk.f32.gmra.mrb[6].mxu1 %vm72_vm0, %v49_v40 }
  0x20   :  { %1393 = vmatprep.mubr.msk.f32.mxu1 %vm72_vm0, %v50_v41  ;;  %1602 = vmatprep.subr.bf16.mxu0 %v1601_v10 }
  0x21   :  { %1576 = vmatpush3.bf16.msra.mxu1 %v1573_v35  ;;  %1604 = vmatpush3.bf16.msra.mxu0 %v1601_v10 }
  0x22   :  { %1370 = vmatmul.mubr.msk.f32.gmra.mrb[8].mxu0 %vm72_vm0, %v35_v43  ;;  %1578 = vmatprep.subr.bf16.mxu1 %v1577_v42 }
  0x23   :  { %1372 = vmatprep.mubr.msk.f32.mxu0 %vm72_vm0, %v36_v46  ;;  %1394 = vmatmul.mubr.msk.f32.gmra.mrb[8].mxu1 %vm72_vm0, %v51_v47 }
  0x24   :  { %1396 = vmatprep.mubr.msk.f32.mxu1 %vm72_vm0, %v52_v48 }
  0x25   :  { %1580 = vmatpush3.bf16.msra.mxu1 %v1577_v42 }
  0x26   :  { %1373 = vmatmul.mubr.msk.f32.gmra.mrb[10].mxu0 %vm72_vm0, %v37_v50  ;;  %1582 = vmatprep.subr.bf16.mxu1 %v1581_v49 }
  0x27   :  { %1375 = vmatprep.mubr.msk.f32.mxu0 %vm72_vm0, %v38_v51  ;;  %1397 = vmatmul.mubr.msk.f32.gmra.mrb[10].mxu1 %vm72_vm0, %v53_v52 }
  0x28   :  { %1399 = vmatprep.mubr.msk.f32.mxu1 %vm72_vm0, %v54_v53 }
  0x29   :  { %1584 = vmatpush3.bf16.msra.mxu1 %v1581_v49 }
  0x2a   :  { %1376 = vmatmul.mubr.msk.f32.gmra.mrb[12].mxu0 %vm72_vm0, %v39_v54  ;;  %1586 = vmatprep.subr.bf16.mxu1 %v1585_v62 }
  0x2b   :  { %1378 = vmatprep.mubr.msk.f32.mxu0 %vm72_vm0, %v40_v55  ;;  %1400 = vmatmul.mubr.msk.f32.gmra.mrb[12].mxu1 %vm72_vm0, %v55_v56 }
  0x2c   :  { %1402 = vmatprep.mubr.msk.f32.mxu1 %vm72_vm0, %v56_v57 }
  0x2d   :  { %1588 = vmatpush3.bf16.msra.mxu1 %v1585_v62 }
  0x2e   :  { %1379 = vmatmul.mubr.msk.f32.gmra.mrb[14].mxu0 %vm72_vm0, %v41_v58  ;;  %1590 = vmatprep.subr.bf16.mxu1 %v1589_v1 }
  0x2f   :  { %1403 = vmatmul.mubr.msk.f32.gmra.mrb[14].mxu1 %vm72_vm0, %v57_v59 }
  0x31   :  { %1592 = vmatpush3.bf16.msra.mxu1 %v1589_v1 }
  0xe5   :  { %v1359_v12 = vpop.f32.mrb[0].mxu0 }
  0xe6   :  { %v245_v13 = vadd.f32 %v1359_v12, %v1879_v11  ;;  %v239_v14 = vpop.f32.mrb[1].mxu0  ;;  %v1882_v15 = vpop.f32.mrb[0].mxu1 }
  0xe7   :  { %v240_v16 = vadd.f32 %v1879_v11, %v239_v14  ;;  %v1885_v17 = vpop.f32.mrb[1].mxu1 }
  0xe8   :  { %v399_v18 = vmul.f32 0.01, %v245_v13 }
  0xe9   :  { %v398_v19 = vmul.f32 0.01, %v240_v16  ;;  %v1362_v20 = vpop.f32.mrb[2].mxu0 }
  0xea   :  { %v255_v21 = vadd.f32 %v1362_v20, %v1879_v11  ;;  %v249_v22 = vpop.f32.mrb[3].mxu0  ;;  %v1888_v23 = vpop.f32.mrb[2].mxu1  ;;  %v431_v27 = vmax.f32 %v245_v13, %v399_v18  ;;  %v320_v13 = vadd.f32 %v1879_v11, %v1885_v17 }
  0xeb   :  { %v430_v24 = vmax.f32 %v240_v16, %v398_v19  ;;  %v250_v25 = vadd.f32 %v1879_v11, %v249_v22  ;;  %v1891_v26 = vpop.f32.mrb[3].mxu1 }
  0xec   :  { %v401_v28 = vmul.f32 0.01, %v255_v21 }
  0xed   :  { %v400_v29 = vmul.f32 0.01, %v250_v25  ;;  %v1365_v30 = vpop.f32.mrb[4].mxu0  ;;  %1437 = vmatprep.mubr.f32.mxu1 %v430_v24 }
  0xee   :  { %v265_v31 = vadd.f32 %v1365_v30, %v1879_v11  ;;  %v259_v32 = vpop.f32.mrb[5].mxu0  ;;  %1438 = vmatmul.mubr.f32.vlgmr.msra.gmra.mrb[16].mxu1 %v431_v27  ;;  %v1894_v33 = vpop.f32.mrb[4].mxu1  ;;  %v433_v37 = vmax.f32 %v255_v21, %v401_v28  ;;  %v414_v28 = vmul.f32 0.01, %v320_v13 }
  0xef   :  { %v432_v34 = vmax.f32 %v250_v25, %v400_v29  ;;  %v260_v35 = vadd.f32 %v1879_v11, %v259_v32  ;;  %v1897_v36 = vpop.f32.mrb[5].mxu1  ;;  %v330_v29 = vadd.f32 %v1879_v11, %v1891_v26  ;;  %v325_v32 = vadd.f32 %v1882_v15, %v1879_v11 }
  0xf0   :  { %v403_v38 = vmul.f32 0.01, %v265_v31  ;;  %v335_v26 = vadd.f32 %v1888_v23, %v1879_v11 }
  0xf1   :  { %v402_v39 = vmul.f32 0.01, %v260_v35  ;;  %v1368_v40 = vpop.f32.mrb[6].mxu0  ;;  %1440 = vmatprep.mubr.f32.mxu1 %v432_v34 }
  0xf2   :  { %v275_v41 = vadd.f32 %v1368_v40, %v1879_v11  ;;  %v269_v42 = vpop.f32.mrb[7].mxu0  ;;  %1441 = vmatmul.mubr.f32.gmra.mrb[18].mxu1 %v433_v37  ;;  %v1900_v43 = vpop.f32.mrb[6].mxu1  ;;  %v435_v47 = vmax.f32 %v265_v31, %v403_v38  ;;  %v446_v37 = vmax.f32 %v320_v13, %v414_v28  ;;  %v416_v38 = vmul.f32 0.01, %v330_v29 }
  0xf3   :  { %v434_v44 = vmax.f32 %v260_v35, %v402_v39  ;;  %v270_v45 = vadd.f32 %v1879_v11, %v269_v42  ;;  %v1903_v46 = vpop.f32.mrb[7].mxu1  ;;  %v340_v39 = vadd.f32 %v1879_v11, %v1897_v36 }
  0xf4   :  { %v405_v48 = vmul.f32 0.01, %v275_v41  ;;  %v448_v42 = vmax.f32 %v330_v29, %v416_v38  ;;  %v350_v15 = vadd.f32 %v1879_v11, %v1903_v46 }
  0xf5   :  { %v404_v49 = vmul.f32 0.01, %v270_v45  ;;  %v1371_v50 = vpop.f32.mrb[8].mxu0  ;;  %1443 = vmatprep.mubr.f32.mxu1 %v434_v44  ;;  %v418_v44 = vmul.f32 0.01, %v340_v39 }
  0xf6   :  { %v285_v51 = vadd.f32 %v1371_v50, %v1879_v11  ;;  %v279_v52 = vpop.f32.mrb[9].mxu0  ;;  %1444 = vmatmul.mubr.f32.gmra.mrb[20].mxu1 %v435_v47  ;;  %v1906_v53 = vpop.f32.mrb[8].mxu1  ;;  %v437_v57 = vmax.f32 %v275_v41, %v405_v48  ;;  %v415_v41 = vmul.f32 0.01, %v325_v32  ;;  %v417_v47 = vmul.f32 0.01, %v335_v26 }
  0xf7   :  { %v436_v54 = vmax.f32 %v270_v45, %v404_v49  ;;  %v280_v55 = vadd.f32 %v1879_v11, %v279_v52  ;;  %v1909_v56 = vpop.f32.mrb[9].mxu1  ;;  %v345_v48 = vadd.f32 %v1894_v33, %v1879_v11  ;;  %v450_v36 = vmax.f32 %v340_v39, %v418_v44 }
  0xf8   :  { %v407_v58 = vmul.f32 0.01, %v285_v51  ;;  %v447_v45 = vmax.f32 %v325_v32, %v415_v41  ;;  %v420_v49 = vmul.f32 0.01, %v350_v15  ;;  %v360_v23 = vadd.f32 %v1879_v11, %v1909_v56 }
  0xf9   :  { %v406_v59 = vmul.f32 0.01, %v280_v55  ;;  %v1374_v60 = vpop.f32.mrb[10].mxu0  ;;  %1446 = vmatprep.mubr.f32.mxu1 %v436_v54  ;;  %v449_v50 = vmax.f32 %v335_v26, %v417_v47  ;;  %v355_v52 = vadd.f32 %v1900_v43, %v1879_v11 }
  0xfa   :  { %v295_v61 = vadd.f32 %v1374_v60, %v1879_v11  ;;  %v289_v62 = vpop.f32.mrb[11].mxu0  ;;  %1447 = vmatmul.mubr.f32.gmra.mrb[22].mxu1 %v437_v57  ;;  %v1912_v63 = vpop.f32.mrb[10].mxu1  ;;  %v439_v3 = vmax.f32 %v285_v51, %v407_v58  ;;  %v419_v51 = vmul.f32 0.01, %v345_v48  ;;  %v452_v54 = vmax.f32 %v350_v15, %v420_v49 }
  0xfb   :  { %v438_v0 = vmax.f32 %v280_v55, %v406_v59  ;;  %v290_v1 = vadd.f32 %v1879_v11, %v289_v62  ;;  %v369_v2 = vpop.f32.mrb[11].mxu1  ;;  %v422_v46 = vmul.f32 0.01, %v360_v23  ;;  %v421_v33 = vmul.f32 0.01, %v355_v52 }
  0xfc   :  { %v409_v4 = vmul.f32 0.01, %v295_v61  ;;  %v370_v55 = vadd.f32 %v1879_v11, %v369_v2  ;;  %v451_v57 = vmax.f32 %v345_v48, %v419_v51  ;;  %v365_v58 = vadd.f32 %v1906_v53, %v1879_v11 }
  0xfd   :  { %v408_v5 = vmul.f32 0.01, %v290_v1  ;;  %v1377_v6 = vpop.f32.mrb[12].mxu0  ;;  %1449 = vmatprep.mubr.f32.mxu1 %v438_v0  ;;  %v454_v59 = vmax.f32 %v360_v23, %v422_v46  ;;  %v375_v43 = vadd.f32 %v1912_v63, %v1879_v11 }
  0xfe   :  { %v305_v7 = vadd.f32 %v1377_v6, %v1879_v11  ;;  %v299_v8 = vpop.f32.mrb[13].mxu0  ;;  %1450 = vmatmul.mubr.f32.gmra.mrb[24].mxu1 %v439_v3  ;;  %v1916_v9 = vpop.f32.mrb[12].mxu1  ;;  %v441_v16 = vmax.f32 %v295_v61, %v409_v4  ;;  %v424_v60 = vmul.f32 0.01, %v370_v55  ;;  %v453_v61 = vmax.f32 %v355_v52, %v421_v33 }
  0xff   :  { %v440_v10 = vmax.f32 %v290_v1, %v408_v5  ;;  %v300_v12 = vadd.f32 %v1879_v11, %v299_v8  ;;  %v379_v14 = vpop.f32.mrb[13].mxu1  ;;  %v423_v62 = vmul.f32 0.01, %v365_v58  ;;  %v425_v4 = vmul.f32 0.01, %v375_v43 }
 0x100   :  { %v411_v18 = vmul.f32 0.01, %v305_v7  ;;  %v380_v56 = vadd.f32 %v1879_v11, %v379_v14  ;;  %v456_v0 = vmax.f32 %v370_v55, %v424_v60  ;;  %v385_v53 = vadd.f32 %v1916_v9, %v1879_v11  ;;  %v780_v9 = vld [vmem:[%s2195_s5 + $0x30] sm:$0xff] }
 0x101   :  { %v410_v19 = vmul.f32 0.01, %v300_v12  ;;  %v1380_v20 = vpop.f32.mrb[14].mxu0  ;;  %1452 = vmatprep.mubr.f32.mxu1 %v440_v10  ;;  %v455_v3 = vmax.f32 %v365_v58, %v423_v62 }
 0x102   :  { %v315_v21 = vadd.f32 %v1380_v20, %v1879_v11  ;;  %v309_v22 = vpop.f32.mrb[15].mxu0  ;;  %1453 = vmatmul.mubr.f32.gmra.mrb[26].mxu1 %v441_v16  ;;  %v1922_v24 = vpop.f32.mrb[14].mxu1  ;;  %v443_v30 = vmax.f32 %v305_v7, %v411_v18  ;;  %v426_v1 = vmul.f32 0.01, %v380_v56  ;;  %v457_v7 = vmax.f32 %v375_v43, %v425_v4  ;;  %v781_v16 = vld [vmem:[%s2195_s5 + $0x38] sm:$0xff] }
 0x103   :  { %v442_v25 = vmax.f32 %v300_v12, %v410_v19  ;;  %v310_v27 = vadd.f32 %v1879_v11, %v309_v22  ;;  %v389_v17 = vpop.f32.mrb[15].mxu1  ;;  %v427_v8 = vmul.f32 0.01, %v385_v53  ;;  %v395_v63 = vadd.f32 %v1922_v24, %v1879_v11 }
 0x104   :  { %v413_v31 = vmul.f32 0.01, %v315_v21  ;;  %v390_v2 = vadd.f32 %v1879_v11, %v389_v17  ;;  %v458_v5 = vmax.f32 %v380_v56, %v426_v1  ;;  %v1605_v18 = vpack.c.bf16 %v781_v16, %v780_v9  ;;  %v1961_v11 = vld [vmem:[%s2197_s4] ss:$0 sm:$0xff] }
 0x105   :  { %v412_v34 = vmul.f32 0.01, %v310_v27  ;;  %1455 = vmatprep.mubr.f32.mxu1 %v442_v25  ;;  %v459_v12 = vmax.f32 %v385_v53, %v427_v8  ;;  %v429_v13 = vmul.f32 0.01, %v395_v63 }
 0x106   :  { %1456 = vmatmul.mubr.f32.gmra.mrb[28].mxu1 %v443_v30  ;;  %v445_v40 = vmax.f32 %v315_v21, %v413_v31  ;;  %v428_v6 = vmul.f32 0.01, %v390_v2  ;;  %1606 = vmatprep.subr.bf16.mxu0 %v1605_v18 }
 0x107   :  { %v444_v35 = vmax.f32 %v310_v27, %v412_v34  ;;  %v461_v14 = vmax.f32 %v395_v63, %v429_v13  ;;  %1608 = vmatpush3.bf16.msra.mxu0 %v1605_v18 }
 0x108   :  { %v460_v10 = vmax.f32 %v390_v2, %v428_v6 }
 0x109   :  { %1458 = vmatprep.mubr.f32.mxu1 %v444_v35 }
 0x10a   :  { %1459 = vmatmul.mubr.f32.gmra.mrb[30].mxu1 %v445_v40 }
 0x10b   :  { %1461 = vmatprep.mubr.f32.mxu1 %v446_v37 }
 0x10e   :  { %1462 = vmatmul.mubr.f32.gmra.mrb[32].mxu1 %v447_v45 }
 0x10f   :  { %1464 = vmatprep.mubr.f32.mxu1 %v448_v42 }
 0x112   :  { %1465 = vmatmul.mubr.f32.gmra.mrb[34].mxu1 %v449_v50 }
 0x113   :  { %1467 = vmatprep.mubr.f32.mxu1 %v450_v36 }
 0x116   :  { %1468 = vmatmul.mubr.f32.gmra.mrb[36].mxu1 %v451_v57 }
 0x117   :  { %1470 = vmatprep.mubr.f32.mxu1 %v452_v54 }
 0x11a   :  { %1471 = vmatmul.mubr.f32.gmra.mrb[38].mxu1 %v453_v61 }
 0x11b   :  { %1473 = vmatprep.mubr.f32.mxu1 %v454_v59 }
 0x11e   :  { %1474 = vmatmul.mubr.f32.gmra.mrb[40].mxu1 %v455_v3 }
 0x11f   :  { %1476 = vmatprep.mubr.f32.mxu1 %v456_v0 }
 0x122   :  { %1477 = vmatmul.mubr.f32.gmra.mrb[42].mxu1 %v457_v7 }
 0x123   :  { %1479 = vmatprep.mubr.f32.mxu1 %v458_v5 }
 0x126   :  { %1480 = vmatmul.mubr.f32.gmra.mrb[44].mxu1 %v459_v12 }
 0x127   :  { %1482 = vmatprep.mubr.f32.mxu1 %v460_v10 }
 0x12a   :  { %1483 = vmatmul.mubr.f32.gmra.mrb[46].mxu1 %v461_v14 }
 0x1c1   :  { %v1439_v19 = vpop.f32.mrb[16].mxu1 }
 0x1c2   :  { %v557_v20 = vadd.f32 %v1439_v19, %v1961_v11  ;;  %v551_v21 = vpop.f32.mrb[17].mxu1 }
 0x1c3   :  { %v552_v22 = vadd.f32 %v1961_v11, %v551_v21 }
 0x1c4   :  { %v711_v24 = vmul.f32 0.01, %v557_v20 }
 0x1c5   :  { %v710_v25 = vmul.f32 0.01, %v552_v22  ;;  %v1442_v27 = vpop.f32.mrb[18].mxu1 }
 0x1c6   :  { %v567_v28 = vadd.f32 %v1442_v27, %v1961_v11  ;;  %v561_v29 = vpop.f32.mrb[19].mxu1  ;;  %v743_v31 = vmax.f32 %v557_v20, %v711_v24 }
 0x1c7   :  { %v742_v17 = vmax.f32 %v552_v22, %v710_v25  ;;  %v562_v30 = vadd.f32 %v1961_v11, %v561_v29 }
 0x1c8   :  { %v713_v32 = vmul.f32 0.01, %v567_v28 }
 0x1c9   :  { %v712_v34 = vmul.f32 0.01, %v562_v30  ;;  %v1445_v35 = vpop.f32.mrb[20].mxu1  ;;  %1501 = vmatprep.mubr.msk.f32.mxu0 %vm789_vm2, %v742_v17 }
 0x1ca   :  { %v577_v37 = vadd.f32 %v1445_v35, %v1961_v11  ;;  %v571_v38 = vpop.f32.mrb[21].mxu1  ;;  %1502 = vmatmul.mubr.msk.f32.vlgmr.msra.gmra.mrb[16].mxu0 %vm789_vm2, %v743_v31  ;;  %v745_v41 = vmax.f32 %v567_v28, %v713_v32 }
 0x1cb   :  { %v744_v39 = vmax.f32 %v562_v30, %v712_v34  ;;  %v572_v40 = vadd.f32 %v1961_v11, %v571_v38 }
 0x1cc   :  { %v715_v26 = vmul.f32 0.01, %v577_v37 }
 0x1cd   :  { %v714_v42 = vmul.f32 0.01, %v572_v40  ;;  %v1448_v44 = vpop.f32.mrb[22].mxu1  ;;  %1504 = vmatprep.mubr.msk.f32.mxu0 %vm789_vm2, %v744_v39 }
 0x1ce   :  { %v587_v15 = vadd.f32 %v1448_v44, %v1961_v11  ;;  %v581_v45 = vpop.f32.mrb[23].mxu1  ;;  %1505 = vmatmul.mubr.msk.f32.gmra.mrb[18].mxu0 %vm789_vm2, %v745_v41  ;;  %v747_v36 = vmax.f32 %v577_v37, %v715_v26 }
 0x1cf   :  { %v746_v47 = vmax.f32 %v572_v40, %v714_v42  ;;  %v582_v48 = vadd.f32 %v1961_v11, %v581_v45 }
 0x1d0   :  { %v717_v49 = vmul.f32 0.01, %v587_v15 }
 0x1d1   :  { %v716_v23 = vmul.f32 0.01, %v582_v48  ;;  %v1451_v50 = vpop.f32.mrb[24].mxu1  ;;  %1507 = vmatprep.mubr.msk.f32.mxu0 %vm789_vm2, %v746_v47 }
 0x1d2   :  { %v597_v51 = vadd.f32 %v1451_v50, %v1961_v11  ;;  %v591_v52 = vpop.f32.mrb[25].mxu1  ;;  %1508 = vmatmul.mubr.msk.f32.gmra.mrb[20].mxu0 %vm789_vm2, %v747_v36  ;;  %v749_v55 = vmax.f32 %v587_v15, %v717_v49 }
 0x1d3   :  { %v748_v54 = vmax.f32 %v582_v48, %v716_v23  ;;  %v592_v46 = vadd.f32 %v1961_v11, %v591_v52 }
 0x1d4   :  { %v719_v57 = vmul.f32 0.01, %v597_v51 }
 0x1d5   :  { %v718_v33 = vmul.f32 0.01, %v592_v46  ;;  %v1454_v58 = vpop.f32.mrb[26].mxu1  ;;  %1510 = vmatprep.mubr.msk.f32.mxu0 %vm789_vm2, %v748_v54 }
 0x1d6   :  { %v607_v59 = vadd.f32 %v1454_v58, %v1961_v11  ;;  %v601_v60 = vpop.f32.mrb[27].mxu1  ;;  %1511 = vmatmul.mubr.msk.f32.gmra.mrb[22].mxu0 %vm789_vm2, %v749_v55  ;;  %v751_v62 = vmax.f32 %v597_v51, %v719_v57 }
 0x1d7   :  { %v750_v56 = vmax.f32 %v592_v46, %v718_v33  ;;  %v602_v61 = vadd.f32 %v1961_v11, %v601_v60 }
 0x1d8   :  { %v721_v43 = vmul.f32 0.01, %v607_v59 }
 0x1d9   :  { %v720_v0 = vmul.f32 0.01, %v602_v61  ;;  %v1457_v1 = vpop.f32.mrb[28].mxu1  ;;  %1513 = vmatprep.mubr.msk.f32.mxu0 %vm789_vm2, %v750_v56 }
 0x1da   :  { %v617_v2 = vadd.f32 %v1457_v1, %v1961_v11  ;;  %v611_v3 = vpop.f32.mrb[29].mxu1  ;;  %1514 = vmatmul.mubr.msk.f32.gmra.mrb[24].mxu0 %vm789_vm2, %v751_v62  ;;  %v753_v5 = vmax.f32 %v607_v59, %v721_v43 }
 0x1db   :  { %v752_v4 = vmax.f32 %v602_v61, %v720_v0  ;;  %v612_v53 = vadd.f32 %v1961_v11, %v611_v3 }
 0x1dc   :  { %v723_v6 = vmul.f32 0.01, %v617_v2 }
 0x1dd   :  { %v722_v7 = vmul.f32 0.01, %v612_v53  ;;  %v1460_v8 = vpop.f32.mrb[30].mxu1  ;;  %1516 = vmatprep.mubr.msk.f32.mxu0 %vm789_vm2, %v752_v4 }
 0x1de   :  { %v627_v63 = vadd.f32 %v1460_v8, %v1961_v11  ;;  %v621_v10 = vpop.f32.mrb[31].mxu1  ;;  %1517 = vmatmul.mubr.msk.f32.gmra.mrb[26].mxu0 %vm789_vm2, %v753_v5  ;;  %v755_v14 = vmax.f32 %v617_v2, %v723_v6 }
 0x1df   :  { %v754_v12 = vmax.f32 %v612_v53, %v722_v7  ;;  %v622_v13 = vadd.f32 %v1961_v11, %v621_v10 }
 0x1e0   :  { %v725_v9 = vmul.f32 0.01, %v627_v63 }
 0x1e1   :  { %v724_v16 = vmul.f32 0.01, %v622_v13  ;;  %v1463_v18 = vpop.f32.mrb[32].mxu1  ;;  %1519 = vmatprep.mubr.msk.f32.mxu0 %vm789_vm2, %v754_v12 }
 0x1e2   :  { %v637_v19 = vadd.f32 %v1463_v18, %v1961_v11  ;;  %v631_v20 = vpop.f32.mrb[33].mxu1  ;;  %1520 = vmatmul.mubr.msk.f32.gmra.mrb[28].mxu0 %vm789_vm2, %v755_v14  ;;  %v757_v24 = vmax.f32 %v627_v63, %v725_v9 }
 0x1e3   :  { %v756_v21 = vmax.f32 %v622_v13, %v724_v16  ;;  %v632_v22 = vadd.f32 %v1961_v11, %v631_v20 }
 0x1e4   :  { %v727_v25 = vmul.f32 0.01, %v637_v19 }
 0x1e5   :  { %v726_v27 = vmul.f32 0.01, %v632_v22  ;;  %v1466_v28 = vpop.f32.mrb[34].mxu1  ;;  %1522 = vmatprep.mubr.msk.f32.mxu0 %vm789_vm2, %v756_v21  ;;  %v2030_v21 = vld [vmem:[%s2198_s6] ss:$0 sm:$0xff] }
 0x1e6   :  { %v647_v29 = vadd.f32 %v1466_v28, %v1961_v11  ;;  %v641_v17 = vpop.f32.mrb[35].mxu1  ;;  %1523 = vmatmul.mubr.msk.f32.gmra.mrb[30].mxu0 %vm789_vm2, %v757_v24  ;;  %v759_v32 = vmax.f32 %v637_v19, %v727_v25 }
 0x1e7   :  { %v758_v30 = vmax.f32 %v632_v22, %v726_v27  ;;  %v642_v31 = vadd.f32 %v1961_v11, %v641_v17 }
 0x1e8   :  { %v729_v34 = vmul.f32 0.01, %v647_v29 }
 0x1e9   :  { %v728_v35 = vmul.f32 0.01, %v642_v31  ;;  %v1469_v37 = vpop.f32.mrb[36].mxu1  ;;  %1525 = vmatprep.mubr.msk.f32.mxu0 %vm789_vm2, %v758_v30 }
 0x1ea   :  { %v657_v38 = vadd.f32 %v1469_v37, %v1961_v11  ;;  %v651_v39 = vpop.f32.mrb[37].mxu1  ;;  %1526 = vmatmul.mubr.msk.f32.gmra.mrb[32].mxu0 %vm789_vm2, %v759_v32  ;;  %v761_v26 = vmax.f32 %v647_v29, %v729_v34 }
 0x1eb   :  { %v760_v40 = vmax.f32 %v642_v31, %v728_v35  ;;  %v652_v41 = vadd.f32 %v1961_v11, %v651_v39 }
 0x1ec   :  { %v731_v42 = vmul.f32 0.01, %v657_v38 }
 0x1ed   :  { %v730_v44 = vmul.f32 0.01, %v652_v41  ;;  %v1472_v15 = vpop.f32.mrb[38].mxu1  ;;  %1528 = vmatprep.mubr.msk.f32.mxu0 %vm789_vm2, %v760_v40 }
 0x1ee   :  { %v667_v45 = vadd.f32 %v1472_v15, %v1961_v11  ;;  %v661_v47 = vpop.f32.mrb[39].mxu1  ;;  %1529 = vmatmul.mubr.msk.f32.gmra.mrb[34].mxu0 %vm789_vm2, %v761_v26  ;;  %v763_v49 = vmax.f32 %v657_v38, %v731_v42 }
 0x1ef   :  { %v762_v48 = vmax.f32 %v652_v41, %v730_v44  ;;  %v662_v36 = vadd.f32 %v1961_v11, %v661_v47 }
 0x1f0   :  { %v733_v23 = vmul.f32 0.01, %v667_v45 }
 0x1f1   :  { %v732_v50 = vmul.f32 0.01, %v662_v36  ;;  %v1475_v51 = vpop.f32.mrb[40].mxu1  ;;  %1531 = vmatprep.mubr.msk.f32.mxu0 %vm789_vm2, %v762_v48 }
 0x1f2   :  { %v677_v52 = vadd.f32 %v1475_v51, %v1961_v11  ;;  %v671_v54 = vpop.f32.mrb[41].mxu1  ;;  %1532 = vmatmul.mubr.msk.f32.gmra.mrb[36].mxu0 %vm789_vm2, %v763_v49  ;;  %v765_v57 = vmax.f32 %v667_v45, %v733_v23 }
 0x1f3   :  { %v764_v46 = vmax.f32 %v662_v36, %v732_v50  ;;  %v672_v55 = vadd.f32 %v1961_v11, %v671_v54 }
 0x1f4   :  { %v735_v33 = vmul.f32 0.01, %v677_v52 }
 0x1f5   :  { %v734_v58 = vmul.f32 0.01, %v672_v55  ;;  %v1478_v59 = vpop.f32.mrb[42].mxu1  ;;  %1534 = vmatprep.mubr.msk.f32.mxu0 %vm789_vm2, %v764_v46 }
 0x1f6   :  { %v687_v60 = vadd.f32 %v1478_v59, %v1961_v11  ;;  %v681_v56 = vpop.f32.mrb[43].mxu1  ;;  %1535 = vmatmul.mubr.msk.f32.gmra.mrb[38].mxu0 %vm789_vm2, %v765_v57  ;;  %v767_v43 = vmax.f32 %v677_v52, %v735_v33 }
 0x1f7   :  { %v766_v61 = vmax.f32 %v672_v55, %v734_v58  ;;  %v682_v62 = vadd.f32 %v1961_v11, %v681_v56 }
 0x1f8   :  { %v737_v0 = vmul.f32 0.01, %v687_v60 }
 0x1f9   :  { %v736_v1 = vmul.f32 0.01, %v682_v62  ;;  %v1481_v2 = vpop.f32.mrb[44].mxu1  ;;  %1537 = vmatprep.mubr.msk.f32.mxu0 %vm789_vm2, %v766_v61 }
 0x1fa   :  { %v697_v3 = vadd.f32 %v1481_v2, %v1961_v11  ;;  %v691_v4 = vpop.f32.mrb[45].mxu1  ;;  %1538 = vmatmul.mubr.msk.f32.gmra.mrb[40].mxu0 %vm789_vm2, %v767_v43  ;;  %v769_v6 = vmax.f32 %v687_v60, %v737_v0 }
 0x1fb   :  { %v768_v53 = vmax.f32 %v682_v62, %v736_v1  ;;  %v692_v5 = vadd.f32 %v1961_v11, %v691_v4 }
 0x1fc   :  { %v739_v7 = vmul.f32 0.01, %v697_v3 }
 0x1fd   :  { %v738_v8 = vmul.f32 0.01, %v692_v5  ;;  %v1484_v63 = vpop.f32.mrb[46].mxu1  ;;  %1540 = vmatprep.mubr.msk.f32.mxu0 %vm789_vm2, %v768_v53 }
 0x1fe   :  { %v707_v10 = vadd.f32 %v1484_v63, %v1961_v11  ;;  %v701_v12 = vpop.f32.mrb[47].mxu1  ;;  %1541 = vmatmul.mubr.msk.f32.gmra.mrb[42].mxu0 %vm789_vm2, %v769_v6  ;;  %v771_v9 = vmax.f32 %v697_v3, %v739_v7 }
 0x1ff   :  { %v770_v13 = vmax.f32 %v692_v5, %v738_v8  ;;  %v702_v14 = vadd.f32 %v1961_v11, %v701_v12 }
 0x200   :  { %v741_v16 = vmul.f32 0.01, %v707_v10 }
 0x201   :  { %v740_v18 = vmul.f32 0.01, %v702_v14  ;;  %1543 = vmatprep.mubr.msk.f32.mxu0 %vm789_vm2, %v770_v13 }
 0x202   :  { %1544 = vmatmul.mubr.msk.f32.gmra.mrb[44].mxu0 %vm789_vm2, %v771_v9  ;;  %v773_v20 = vmax.f32 %v707_v10, %v741_v16 }
 0x203   :  { %v772_v19 = vmax.f32 %v702_v14, %v740_v18 }
 0x205   :  { %1546 = vmatprep.mubr.msk.f32.mxu0 %vm789_vm2, %v772_v19 }
 0x206   :  { %1547 = vmatmul.mubr.msk.f32.gmra.mrb[46].mxu0 %vm789_vm2, %v773_v20 }
 0x29d   :  { %v1503_v22 = vpop.f32.mrb[16].mxu0 }
 0x29e   :  { %v958_v11 = vadd.f32 %v1503_v22, %v2030_v21  ;;  %v952_v24 = vpop.f32.mrb[17].mxu0 }
 0x29f   :  { %v953_v25 = vadd.f32 %v2030_v21, %v952_v24 }
 0x2a0   :  { %1113 = vst.msk [vmem:[%s2199_s7 + $0x8] sm:$0xff] %vm1111_vm3, %v958_v11 }
 0x2a1   :  { %1112 = vst.msk [vmem:[%s2199_s7] sm:$0xff] %vm1111_vm3, %v953_v25  ;;  %v1506_v27 = vpop.f32.mrb[18].mxu0 }
 0x2a2   :  { %v968_v28 = vadd.f32 %v1506_v27, %v2030_v21  ;;  %v962_v29 = vpop.f32.mrb[19].mxu0 }
 0x2a3   :  { %v963_v17 = vadd.f32 %v2030_v21, %v962_v29 }
 0x2a4   :  { %1115 = vst.msk [vmem:[%s2199_s7 + $0x18] sm:$0xff] %vm1111_vm3, %v968_v28 }
 0x2a5   :  { %1114 = vst.msk [vmem:[%s2199_s7 + $0x10] sm:$0xff] %vm1111_vm3, %v963_v17  ;;  %v1509_v30 = vpop.f32.mrb[20].mxu0 }
 0x2a6   :  { %v978_v31 = vadd.f32 %v1509_v30, %v2030_v21  ;;  %v972_v32 = vpop.f32.mrb[21].mxu0 }
 0x2a7   :  { %v973_v34 = vadd.f32 %v2030_v21, %v972_v32 }
 0x2a8   :  { %1117 = vst.msk [vmem:[%s2199_s7 + $0x28] sm:$0xff] %vm1111_vm3, %v978_v31 }
 0x2a9   :  { %1116 = vst.msk [vmem:[%s2199_s7 + $0x20] sm:$0xff] %vm1111_vm3, %v973_v34  ;;  %v1512_v35 = vpop.f32.mrb[22].mxu0 }
 0x2aa   :  { %v988_v37 = vadd.f32 %v1512_v35, %v2030_v21  ;;  %v982_v38 = vpop.f32.mrb[23].mxu0 }
 0x2ab   :  { %v983_v39 = vadd.f32 %v2030_v21, %v982_v38 }
 0x2ac   :  { %1119 = vst.msk [vmem:[%s2199_s7 + $0x38] sm:$0xff] %vm1111_vm3, %v988_v37 }
 0x2ad   :  { %1118 = vst.msk [vmem:[%s2199_s7 + $0x30] sm:$0xff] %vm1111_vm3, %v983_v39  ;;  %v1515_v40 = vpop.f32.mrb[24].mxu0 }
 0x2ae   :  { %v998_v41 = vadd.f32 %v1515_v40, %v2030_v21  ;;  %v992_v26 = vpop.f32.mrb[25].mxu0 }
 0x2af   :  { %v993_v42 = vadd.f32 %v2030_v21, %v992_v26 }
 0x2b0   :  { %1121 = vst.msk [vmem:[%s2199_s7 + $0x48] sm:$0xff] %vm1111_vm3, %v998_v41 }
 0x2b1   :  { %1120 = vst.msk [vmem:[%s2199_s7 + $0x40] sm:$0xff] %vm1111_vm3, %v993_v42  ;;  %v1518_v44 = vpop.f32.mrb[26].mxu0 }
 0x2b2   :  { %v1008_v15 = vadd.f32 %v1518_v44, %v2030_v21  ;;  %v1002_v45 = vpop.f32.mrb[27].mxu0 }
 0x2b3   :  { %v1003_v47 = vadd.f32 %v2030_v21, %v1002_v45 }
 0x2b4   :  { %1123 = vst.msk [vmem:[%s2199_s7 + $0x58] sm:$0xff] %vm1111_vm3, %v1008_v15 }
 0x2b5   :  { %1122 = vst.msk [vmem:[%s2199_s7 + $0x50] sm:$0xff] %vm1111_vm3, %v1003_v47  ;;  %v1521_v48 = vpop.f32.mrb[28].mxu0 }
 0x2b6   :  { %v1018_v36 = vadd.f32 %v1521_v48, %v2030_v21  ;;  %v1012_v49 = vpop.f32.mrb[29].mxu0 }
 0x2b7   :  { %v1013_v23 = vadd.f32 %v2030_v21, %v1012_v49 }
 0x2b8   :  { %1125 = vst.msk [vmem:[%s2199_s7 + $0x68] sm:$0xff] %vm1111_vm3, %v1018_v36 }
 0x2b9   :  { %1124 = vst.msk [vmem:[%s2199_s7 + $0x60] sm:$0xff] %vm1111_vm3, %v1013_v23  ;;  %v1524_v50 = vpop.f32.mrb[30].mxu0 }
 0x2ba   :  { %v1028_v51 = vadd.f32 %v1524_v50, %v2030_v21  ;;  %v1022_v52 = vpop.f32.mrb[31].mxu0 }
 0x2bb   :  { %v1023_v54 = vadd.f32 %v2030_v21, %v1022_v52 }
 0x2bc   :  { %1127 = vst.msk [vmem:[%s2199_s7 + $0x78] sm:$0xff] %vm1111_vm3, %v1028_v51 }
 0x2bd   :  { %1126 = vst.msk [vmem:[%s2199_s7 + $0x70] sm:$0xff] %vm1111_vm3, %v1023_v54  ;;  %v1527_v46 = vpop.f32.mrb[32].mxu0 }
 0x2be   :  { %v1038_v55 = vadd.f32 %v1527_v46, %v2030_v21  ;;  %v1032_v57 = vpop.f32.mrb[33].mxu0 }
 0x2bf   :  { %v1033_v33 = vadd.f32 %v2030_v21, %v1032_v57 }
 0x2c0   :  { %1129 = vst.msk [vmem:[%s2199_s7 + $0x88] sm:$0xff] %vm1111_vm3, %v1038_v55 }
 0x2c1   :  { %1128 = vst.msk [vmem:[%s2199_s7 + $0x80] sm:$0xff] %vm1111_vm3, %v1033_v33  ;;  %v1530_v58 = vpop.f32.mrb[34].mxu0 }
 0x2c2   :  { %v1048_v59 = vadd.f32 %v1530_v58, %v2030_v21  ;;  %v1042_v60 = vpop.f32.mrb[35].mxu0 }
 0x2c3   :  { %v1043_v56 = vadd.f32 %v2030_v21, %v1042_v60 }
 0x2c4   :  { %1131 = vst.msk [vmem:[%s2199_s7 + $0x98] sm:$0xff] %vm1111_vm3, %v1048_v59 }
 0x2c5   :  { %1130 = vst.msk [vmem:[%s2199_s7 + $0x90] sm:$0xff] %vm1111_vm3, %v1043_v56  ;;  %v1533_v61 = vpop.f32.mrb[36].mxu0 }
 0x2c6   :  { %v1058_v62 = vadd.f32 %v1533_v61, %v2030_v21  ;;  %v1052_v43 = vpop.f32.mrb[37].mxu0 }
 0x2c7   :  { %v1053_v0 = vadd.f32 %v2030_v21, %v1052_v43 }
 0x2c8   :  { %1133 = vst.msk [vmem:[%s2199_s7 + $0xa8] sm:$0xff] %vm1111_vm3, %v1058_v62 }
 0x2c9   :  { %1132 = vst.msk [vmem:[%s2199_s7 + $0xa0] sm:$0xff] %vm1111_vm3, %v1053_v0  ;;  %v1536_v1 = vpop.f32.mrb[38].mxu0 }
 0x2ca   :  { %v1068_v2 = vadd.f32 %v1536_v1, %v2030_v21  ;;  %v1062_v3 = vpop.f32.mrb[39].mxu0 }
 0x2cb   :  { %v1063_v4 = vadd.f32 %v2030_v21, %v1062_v3 }
 0x2cc   :  { %1135 = vst.msk [vmem:[%s2199_s7 + $0xb8] sm:$0xff] %vm1111_vm3, %v1068_v2 }
 0x2cd   :  { %1134 = vst.msk [vmem:[%s2199_s7 + $0xb0] sm:$0xff] %vm1111_vm3, %v1063_v4  ;;  %v1539_v53 = vpop.f32.mrb[40].mxu0 }
 0x2ce   :  { %v1078_v5 = vadd.f32 %v1539_v53, %v2030_v21  ;;  %v1072_v6 = vpop.f32.mrb[41].mxu0 }
 0x2cf   :  { %v1073_v7 = vadd.f32 %v2030_v21, %v1072_v6 }
 0x2d0   :  { %1137 = vst.msk [vmem:[%s2199_s7 + $0xc8] sm:$0xff] %vm1111_vm3, %v1078_v5 }
 0x2d1   :  { %1136 = vst.msk [vmem:[%s2199_s7 + $0xc0] sm:$0xff] %vm1111_vm3, %v1073_v7  ;;  %v1542_v8 = vpop.f32.mrb[42].mxu0 }
 0x2d2   :  { %v1088_v63 = vadd.f32 %v1542_v8, %v2030_v21  ;;  %v1082_v10 = vpop.f32.mrb[43].mxu0 }
 0x2d3   :  { %v1083_v12 = vadd.f32 %v2030_v21, %v1082_v10 }
 0x2d4   :  { %1139 = vst.msk [vmem:[%s2199_s7 + $0xd8] sm:$0xff] %vm1111_vm3, %v1088_v63 }
 0x2d5   :  { %1138 = vst.msk [vmem:[%s2199_s7 + $0xd0] sm:$0xff] %vm1111_vm3, %v1083_v12  ;;  %v1545_v13 = vpop.f32.mrb[44].mxu0 }
 0x2d6   :  { %v1098_v14 = vadd.f32 %v1545_v13, %v2030_v21  ;;  %v1092_v9 = vpop.f32.mrb[45].mxu0 }
 0x2d7   :  { %v1093_v16 = vadd.f32 %v2030_v21, %v1092_v9 }
 0x2d8   :  { %1141 = vst.msk [vmem:[%s2199_s7 + $0xe8] sm:$0xff] %vm1111_vm3, %v1098_v14 }
 0x2d9   :  { %1140 = vst.msk [vmem:[%s2199_s7 + $0xe0] sm:$0xff] %vm1111_vm3, %v1093_v16  ;;  %v1548_v18 = vpop.f32.mrb[46].mxu0 }
 0x2da   :  { %v1108_v19 = vadd.f32 %v1548_v18, %v2030_v21  ;;  %v1102_v20 = vpop.f32.mrb[47].mxu0 }
 0x2db   :  { %v1103_v22 = vadd.f32 %v2030_v21, %v1102_v20 }
 0x2dc   :  { %1143 = vst.msk [vmem:[%s2199_s7 + $0xf8] sm:$0xff] %vm1111_vm3, %v1108_v19 }
 0x2dd   :  { %1142 = vst.msk [vmem:[%s2199_s7 + $0xf0] sm:$0xff] %vm1111_vm3, %v1103_v22 }

</bundles_post_ra>
